<compile_context>
chip_gen: v5e
topology: v5e:2x2
jax: 0.10.0
libtpu: 0.0.40
codegen_flags: <defaults>
</compile_context>

<pallas_src>
import jax
import jax.numpy as jnp
import numpy as np
from jax.experimental import pallas as pl
from jax.experimental.pallas import tpu as pltpu


# --------------------------- slab layout constants -------------------------- #
OUT = 128                      # lane-padded feature width (hidden<=64 fits; head sliced after)
K_ENC = 16                     # padded K for the fused net1 encode dot ([A@x | eagg | deg | 0])
R_ENC = 0
R_W2N = R_ENC + K_ENC          # 16
R_W1S = R_W2N + OUT            # 144
R_W2S = R_W1S + 2 * OUT        # 400
R_W3A = R_W2S + 2 * OUT        # 656
R_W3B = R_W3A + OUT            # 784
R_END = R_W3B + OUT            # 912   (all offsets multiples of 16 -> bf16 tile aligned)


# ------------------------------- Pallas kernel ------------------------------ #
def graphnet_kernel(enc_ref, a_ref, dinv_ref, w_ref, b_ref, out_ref):
    f32, bf16 = jnp.float32, jnp.bfloat16
    relu = lambda v: jnp.maximum(v, 0.0)

    A = a_ref[...]                 # [N, N]   bf16 (exact small integer edge counts)
    dinv = dinv_ref[...]           # [N, 1]   f32, 1/in-degree (0 for isolated nodes)
    B = b_ref[...]                 # [8, 128] f32 bias slab (one vreg)
    b2n, bl1, bl2, b3a, b3b = B[0:1, :], B[1:2, :], B[2:3, :], B[3:4, :], B[4:5, :]

    # ---- net1 / GraphConv1 (aggr='add'): node+edge encodes, degree-scaled biases
    # and the A-aggregation of the (linear) node term all folded into ONE bf16 dot.
    h1 = relu(jnp.dot(enc_ref[...], w_ref[R_ENC:R_W2N, :], preferred_element_type=f32))

    # ---- net1 / GraphConv2 (aggr='add'; conv-level bias is zero-initialized) ----
    hn2 = jnp.dot(h1.astype(bf16), w_ref[R_W2N:R_W1S, :], preferred_element_type=f32) + b2n
    x_temp = jnp.dot(A, hn2.astype(bf16), preferred_element_type=f32)
    x2 = relu(x_temp)              # self.act(x_temp)

    # ---- net2 / GraphSAGE layer 1 (mean aggr, root weight; [lin_l ; lin_r] fused,
    # both concat halves are 128-lane padded so the concat is vreg-aligned) --------
    agg1 = jnp.dot(A, x2.astype(bf16), preferred_element_type=f32) * dinv
    cat1 = jnp.concatenate([agg1, x2], axis=-1).astype(bf16)              # [N, 256]
    s1 = relu(jnp.dot(cat1, w_ref[R_W1S:R_W2S, :], preferred_element_type=f32) + bl1)
    # TODO(synk): nn.Dropout(p=0.1) between SAGE layers is an eval-mode identity here.

    # ---- net2 / GraphSAGE layer 2 (no activation after the final SAGE layer) -----
    agg2 = jnp.dot(A, s1.astype(bf16), preferred_element_type=f32) * dinv
    cat2 = jnp.concatenate([agg2, s1], axis=-1).astype(bf16)              # [N, 256]
    s2 = jnp.dot(cat2, w_ref[R_W2S:R_W3A, :], preferred_element_type=f32) + bl2

    # ---- residual + net3 MLP head (output is already 128-lane dense) -------------
    x3 = relu(s2) + x_temp                                                # act(net2) + x_temp
    h3 = relu(jnp.dot(x3.astype(bf16), w_ref[R_W3A:R_W3B, :], preferred_element_type=f32) + b3a)
    y = jnp.dot(h3.astype(bf16), w_ref[R_W3B:R_END, :], preferred_element_type=f32) + b3b
    out_ref[...] = jax.nn.sigmoid(y)                                      # [N, 128] lane-dense


# --------------------------------- wrapper ----------------------------------- #
def graphnet_forward(node_attr, edge_attr, edge_index, params, *, n_timesteps, n_fields):
    (w1n, b1n, w1e, b1e, w2n, b2n,
     wl1, bl1, wr1, wl2, bl2, wr2,
     w3a, b3a, w3b, b3b) = params

    N, Fn = node_attr.shape
    Fe = edge_attr.shape[1]
    H = w1n.shape[1]
    H2 = 2 * H
    out_dim = n_fields * n_timesteps
    assert H2 <= OUT and Fn + Fe + 1 <= K_ENC and out_dim <= OUT
    src, tgt = edge_index[0], edge_index[1]

    # --- plain-JAX glue: dense adjacency, degrees, and per-target pre-aggregation
    # of node / edge features (exact, because GraphConv1 is linear pre-ReLU). -----
    x = node_attr.astype(jnp.float32)
    A = jnp.zeros((N, N), jnp.float32).at[tgt, src].add(1.0)
    deg = jnp.sum(A, axis=1, keepdims=True)                       # in-degree
    dinv = jnp.where(deg > 0, 1.0 / jnp.maximum(deg, 1.0), 0.0)   # SAGE mean normalizer
    xagg = jnp.zeros((N, Fn), jnp.float32).at[tgt].add(x[src])    # A @ x
    eagg = jnp.zeros((N, Fe), jnp.float32).at[tgt].add(edge_attr.astype(jnp.float32))

    # fused encode input: [A@x | eagg | deg | zero-pad] -> bf16
    enc_in = (jnp.zeros((N, K_ENC), jnp.float32)
              .at[:, :Fn].set(xagg)
              .at[:, Fn:Fn + Fe].set(eagg)
              .at[:, Fn + Fe].set(deg[:, 0])).astype(jnp.bfloat16)

    # --- single bf16 weight slab [R_END, 128]: every block's output columns are
    # zero-padded to 128 lanes so all intermediates stay lane-dense in-kernel. ----
    z = lambda r: jnp.zeros((r, OUT), jnp.float32)
    w_enc_b = (z(K_ENC).at[:Fn, :H].set(w1n)
                       .at[Fn:Fn + Fe, :H].set(w1e)
                       .at[Fn + Fe, :H].set((b1n + b1e)[0]))       # deg column * combined bias
    w2n_b = z(OUT).at[:H, :H].set(w2n)
    w1s_b = z(2 * OUT).at[:H, :H2].set(wl1).at[OUT:OUT + H, :H2].set(wr1)      # [lin_l ; lin_r]
    w2s_b = z(2 * OUT).at[:H2, :H].set(wl2).at[OUT:OUT + H2, :H].set(wr2)      # [lin_l ; lin_r]
    w3a_b = z(OUT).at[:H, :H].set(w3a)
    w3b_b = z(OUT).at[:H, :out_dim].set(w3b)
    wslab = jnp.concatenate([w_enc_b, w2n_b, w1s_b, w2s_b, w3a_b, w3b_b],
                            axis=0).astype(jnp.bfloat16)           # [912, 128] bf16

    # --- single f32 bias slab [8, 128] --------------------------------------------
    bslab = (jnp.zeros((8, OUT), jnp.float32)
             .at[0, :H].set(b2n[0])
             .at[1, :H2].set(bl1[0])
             .at[2, :H].set(bl2[0])
             .at[3, :H].set(b3a[0])
             .at[4, :out_dim].set(b3b[0]))

    ins = (enc_in, A.astype(jnp.bfloat16), dinv, wslab, bslab)

    vmem = pl.BlockSpec(memory_space=pltpu.MemorySpace.VMEM)
    out = pl.pallas_call(
        graphnet_kernel,
        out_shape=jax.ShapeDtypeStruct((N, OUT), jnp.float32),
        in_specs=[vmem] * len(ins),
        out_specs=vmem,
        # 32 MiB is safe on v5e/v6e/v7x at these sizes; re-budget from 64 MiB if N grows on v7x.
        compiler_params=pltpu.CompilerParams(vmem_limit_bytes=32 * 1024 * 1024),
    )(*ins)
    return out[:, :out_dim].reshape(-1, n_timesteps, n_fields)


# pure-JAX f32 reference using true scatter message-passing semantics (independent of
# the dense-A / pre-aggregation / padding reinterpretation used inside the kernel).
def graphnet_reference(node_attr, edge_attr, edge_index, params, *, n_timesteps, n_fields):
    (w1n, b1n, w1e, b1e, w2n, b2n,
     wl1, bl1, wr1, wl2, bl2, wr2,
     w3a, b3a, w3b, b3b) = params
    N = node_attr.shape[0]
    src, tgt = edge_index[0], edge_index[1]
    x = node_attr.astype(jnp.float32)
    e = edge_attr.astype(jnp.float32)

    def scatter_add(msgs):
        return jnp.zeros((N, msgs.shape[1]), jnp.float32).at[tgt].add(msgs)

    deg = jnp.zeros((N, 1), jnp.float32).at[tgt].add(1.0)
    dinv = jnp.where(deg > 0, 1.0 / jnp.maximum(deg, 1.0), 0.0)

    # net1: GraphConv(aggr='add') x2
    h1 = jnp.maximum(scatter_add((x @ w1n + b1n)[src] + (e @ w1e + b1e)), 0.0)
    x_temp = scatter_add((h1 @ w2n + b2n)[src])
    x2 = jnp.maximum(x_temp, 0.0)
    # net2: GraphSAGE (mean aggregation, root weight)
    agg1 = scatter_add(x2[src]) * dinv
    s1 = jnp.maximum(agg1 @ wl1 + bl1 + x2 @ wr1, 0.0)
    agg2 = scatter_add(s1[src]) * dinv
    s2 = agg2 @ wl2 + bl2 + s1 @ wr2
    # residual + net3 head
    x3 = jnp.maximum(s2, 0.0) + x_temp
    y = jnp.maximum(x3 @ w3a + b3a, 0.0) @ w3b + b3b
    return jax.nn.sigmoid(y).reshape(-1, n_timesteps, n_fields)


def make_linear(key, fan_in, fan_out):
    # deterministic PyTorch-style init: U(-1/sqrt(fan_in), 1/sqrt(fan_in)); weight stored [in, out]
    kw, kb = jax.random.split(key)
    bound = 1.0 / np.sqrt(fan_in)
    w = jax.random.uniform(kw, (fan_in, fan_out), jnp.float32, -bound, bound)
    b = jax.random.uniform(kb, (1, fan_out), jnp.float32, -bound, bound)
    return w, b


if __name__ == "__main__":
    # Small configuration consistent with the module's constructor.
    n_fields = 2                 # n_fields (int) -> (2, 0)
    n_meshfields = (4, 3)        # node features = 4, edge features = 3
    hidden = 32
    n_timesteps = 4
    N = 16                       # nodes of a 1-D tree (chain), bidirectional edges
    Fn, Fe = n_meshfields

    key = jax.random.PRNGKey(0)
    keys = jax.random.split(key, 16)

    # Chain graph: edges i->i+1 and i+1->i  (E = 2*(N-1) = 30)
    src = np.concatenate([np.arange(N - 1), np.arange(1, N)])
    tgt = np.concatenate([np.arange(1, N), np.arange(N - 1)])
    edge_index = jnp.asarray(np.stack([src, tgt]), dtype=jnp.int32)
    E = edge_index.shape[1]

    node_attr = jax.random.normal(keys[0], (N, Fn), jnp.float32)
    edge_attr = jax.random.normal(keys[1], (E, Fe), jnp.float32)

    # Parameters (GraphConv conv-biases are zero-initialized in reset_parameters -> omitted).
    w1n, b1n = make_linear(keys[2], Fn, hidden)          # GraphConv1.node_encode
    w1e, b1e = make_linear(keys[3], Fe, hidden)          # GraphConv1.edge_encode
    w2n, b2n = make_linear(keys[4], hidden, hidden)      # GraphConv2.node_encode
    wl1, bl1 = make_linear(keys[5], hidden, 2 * hidden)  # SAGEConv1.lin_l
    wr1, _ = make_linear(keys[6], hidden, 2 * hidden)    # SAGEConv1.lin_r (no bias)
    wl2, bl2 = make_linear(keys[7], 2 * hidden, hidden)  # SAGEConv2.lin_l
    wr2, _ = make_linear(keys[8], 2 * hidden, hidden)    # SAGEConv2.lin_r (no bias)
    w3a, b3a = make_linear(keys[9], hidden, hidden)      # net3.Linear
    w3b, b3b = make_linear(keys[10], hidden, n_fields * n_timesteps)  # net3.Linear

    params = (w1n, b1n, w1e, b1e, w2n, b2n,
              wl1, bl1, wr1, wl2, bl2, wr2,
              w3a, b3a, w3b, b3b)

    out = graphnet_forward(node_attr, edge_attr, edge_index, params,
                           n_timesteps=n_timesteps, n_fields=n_fields)
    out = jax.block_until_ready(out)

    ref = graphnet_reference(node_attr, edge_attr, edge_index, params,
                             n_timesteps=n_timesteps, n_fields=n_fields)
    assert out.shape == (N, n_timesteps, n_fields)
    # Tolerance loosened because every matmul (including the four A-aggregations)
    # runs with bf16 operands / f32 accumulation; the f32 reference bounds the error.
    np.testing.assert_allclose(np.asarray(out), np.asarray(ref), rtol=2e-2, atol=2e-2)
    print("KERNEL_OK")
</pallas_src>

<mosaic_0001>
module attributes {stable_mosaic.version = 11 : i64} {
  func.func @graphnet_kernel(%arg0: memref<16x16xbf16, #tpu.memory_space<vmem>>, %arg1: memref<16x16xbf16, #tpu.memory_space<vmem>>, %arg2: memref<16x1xf32, #tpu.memory_space<vmem>>, %arg3: memref<912x128xbf16, #tpu.memory_space<vmem>>, %arg4: memref<8x128xf32, #tpu.memory_space<vmem>>, %arg5: memref<16x128xf32, #tpu.memory_space<vmem>>) attributes {dimension_semantics = [], scalar_prefetch = 0 : i64, scratch_operands = 0 : i64, tpu.core_type = #tpu.core_type<tc>} {
    %c0 = arith.constant 0 : index
    %c0_0 = arith.constant 0 : index
    %0 = vector.load %arg1[%c0, %c0_0] : memref<16x16xbf16, #tpu.memory_space<vmem>>, vector<16x16xbf16>
    %c0_1 = arith.constant 0 : index
    %c0_2 = arith.constant 0 : index
    %1 = vector.load %arg2[%c0_1, %c0_2] : memref<16x1xf32, #tpu.memory_space<vmem>>, vector<16x1xf32>
    %c0_3 = arith.constant 0 : index
    %c0_4 = arith.constant 0 : index
    %2 = vector.load %arg4[%c0_3, %c0_4] : memref<8x128xf32, #tpu.memory_space<vmem>>, vector<8x128xf32>
    %3 = vector.extract_strided_slice %2 {offsets = [0, 0], sizes = [1, 128], strides = [1, 1]} : vector<8x128xf32> to vector<1x128xf32>
    %4 = vector.extract_strided_slice %2 {offsets = [1, 0], sizes = [1, 128], strides = [1, 1]} : vector<8x128xf32> to vector<1x128xf32>
    %5 = vector.extract_strided_slice %2 {offsets = [2, 0], sizes = [1, 128], strides = [1, 1]} : vector<8x128xf32> to vector<1x128xf32>
    %6 = vector.extract_strided_slice %2 {offsets = [3, 0], sizes = [1, 128], strides = [1, 1]} : vector<8x128xf32> to vector<1x128xf32>
    %7 = vector.extract_strided_slice %2 {offsets = [4, 0], sizes = [1, 128], strides = [1, 1]} : vector<8x128xf32> to vector<1x128xf32>
    %c0_5 = arith.constant 0 : index
    %c0_6 = arith.constant 0 : index
    %8 = vector.load %arg0[%c0_5, %c0_6] : memref<16x16xbf16, #tpu.memory_space<vmem>>, vector<16x16xbf16>
    %c0_7 = arith.constant 0 : index
    %c0_8 = arith.constant 0 : index
    %9 = vector.load %arg3[%c0_7, %c0_8] : memref<912x128xbf16, #tpu.memory_space<vmem>>, vector<16x128xbf16>
    %cst = arith.constant dense<0.000000e+00> : vector<16x128xf32>
    %10 = tpu.matmul %8, %9, %cst {dimension_numbers = #tpu.dot_dimension_numbers<[1], [0], [0], [1], [0, 0, 1, 1], [], []>} : vector<16x16xbf16>, vector<16x128xbf16>, vector<16x128xf32> -> vector<16x128xf32>
    %cst_9 = arith.constant 0.000000e+00 : f32
    %11 = vector.broadcast %cst_9 : f32 to vector<16x128xf32>
    %12 = arith.maximumf %10, %11 : vector<16x128xf32>
    %13 = arith.truncf %12 : vector<16x128xf32> to vector<16x128xbf16>
    %c16 = arith.constant 16 : index
    %c0_10 = arith.constant 0 : index
    %14 = vector.load %arg3[%c16, %c0_10] : memref<912x128xbf16, #tpu.memory_space<vmem>>, vector<128x128xbf16>
    %cst_11 = arith.constant dense<0.000000e+00> : vector<16x128xf32>
    %15 = tpu.matmul %13, %14, %cst_11 {dimension_numbers = #tpu.dot_dimension_numbers<[1], [0], [0], [1], [0, 0, 1, 1], [], []>} : vector<16x128xbf16>, vector<128x128xbf16>, vector<16x128xf32> -> vector<16x128xf32>
    %16 = vector.broadcast %3 : vector<1x128xf32> to vector<16x128xf32>
    %17 = arith.addf %15, %16 : vector<16x128xf32>
    %18 = arith.truncf %17 : vector<16x128xf32> to vector<16x128xbf16>
    %cst_12 = arith.constant dense<0.000000e+00> : vector<16x128xf32>
    %19 = tpu.matmul %0, %18, %cst_12 {dimension_numbers = #tpu.dot_dimension_numbers<[1], [0], [0], [1], [0, 0, 1, 1], [], []>} : vector<16x16xbf16>, vector<16x128xbf16>, vector<16x128xf32> -> vector<16x128xf32>
    %cst_13 = arith.constant 0.000000e+00 : f32
    %20 = vector.broadcast %cst_13 : f32 to vector<16x128xf32>
    %21 = arith.maximumf %19, %20 : vector<16x128xf32>
    %22 = arith.truncf %21 : vector<16x128xf32> to vector<16x128xbf16>
    %cst_14 = arith.constant dense<0.000000e+00> : vector<16x128xf32>
    %23 = tpu.matmul %0, %22, %cst_14 {dimension_numbers = #tpu.dot_dimension_numbers<[1], [0], [0], [1], [0, 0, 1, 1], [], []>} : vector<16x16xbf16>, vector<16x128xbf16>, vector<16x128xf32> -> vector<16x128xf32>
    %24 = vector.broadcast %1 : vector<16x1xf32> to vector<16x128xf32>
    %25 = arith.mulf %23, %24 : vector<16x128xf32>
    %26 = tpu.concatenate %25, %21 in 1 : vector<16x128xf32>, vector<16x128xf32> -> vector<16x256xf32>
    %27 = arith.truncf %26 : vector<16x256xf32> to vector<16x256xbf16>
    %c144 = arith.constant 144 : index
    %c0_15 = arith.constant 0 : index
    %28 = vector.load %arg3[%c144, %c0_15] : memref<912x128xbf16, #tpu.memory_space<vmem>>, vector<256x128xbf16>
    %cst_16 = arith.constant dense<0.000000e+00> : vector<16x128xf32>
    %29 = tpu.matmul %27, %28, %cst_16 {dimension_numbers = #tpu.dot_dimension_numbers<[1], [0], [0], [1], [0, 0, 1, 1], [], []>} : vector<16x256xbf16>, vector<256x128xbf16>, vector<16x128xf32> -> vector<16x128xf32>
    %30 = vector.broadcast %4 : vector<1x128xf32> to vector<16x128xf32>
    %31 = arith.addf %29, %30 : vector<16x128xf32>
    %cst_17 = arith.constant 0.000000e+00 : f32
    %32 = vector.broadcast %cst_17 : f32 to vector<16x128xf32>
    %33 = arith.maximumf %31, %32 : vector<16x128xf32>
    %34 = arith.truncf %33 : vector<16x128xf32> to vector<16x128xbf16>
    %cst_18 = arith.constant dense<0.000000e+00> : vector<16x128xf32>
    %35 = tpu.matmul %0, %34, %cst_18 {dimension_numbers = #tpu.dot_dimension_numbers<[1], [0], [0], [1], [0, 0, 1, 1], [], []>} : vector<16x16xbf16>, vector<16x128xbf16>, vector<16x128xf32> -> vector<16x128xf32>
    %36 = vector.broadcast %1 : vector<16x1xf32> to vector<16x128xf32>
    %37 = arith.mulf %35, %36 : vector<16x128xf32>
    %38 = tpu.concatenate %37, %33 in 1 : vector<16x128xf32>, vector<16x128xf32> -> vector<16x256xf32>
    %39 = arith.truncf %38 : vector<16x256xf32> to vector<16x256xbf16>
    %c400 = arith.constant 400 : index
    %c0_19 = arith.constant 0 : index
    %40 = vector.load %arg3[%c400, %c0_19] : memref<912x128xbf16, #tpu.memory_space<vmem>>, vector<256x128xbf16>
    %cst_20 = arith.constant dense<0.000000e+00> : vector<16x128xf32>
    %41 = tpu.matmul %39, %40, %cst_20 {dimension_numbers = #tpu.dot_dimension_numbers<[1], [0], [0], [1], [0, 0, 1, 1], [], []>} : vector<16x256xbf16>, vector<256x128xbf16>, vector<16x128xf32> -> vector<16x128xf32>
    %42 = vector.broadcast %5 : vector<1x128xf32> to vector<16x128xf32>
    %43 = arith.addf %41, %42 : vector<16x128xf32>
    %cst_21 = arith.constant 0.000000e+00 : f32
    %44 = vector.broadcast %cst_21 : f32 to vector<16x128xf32>
    %45 = arith.maximumf %43, %44 : vector<16x128xf32>
    %46 = arith.addf %45, %19 : vector<16x128xf32>
    %47 = arith.truncf %46 : vector<16x128xf32> to vector<16x128xbf16>
    %c656 = arith.constant 656 : index
    %c0_22 = arith.constant 0 : index
    %48 = vector.load %arg3[%c656, %c0_22] : memref<912x128xbf16, #tpu.memory_space<vmem>>, vector<128x128xbf16>
    %cst_23 = arith.constant dense<0.000000e+00> : vector<16x128xf32>
    %49 = tpu.matmul %47, %48, %cst_23 {dimension_numbers = #tpu.dot_dimension_numbers<[1], [0], [0], [1], [0, 0, 1, 1], [], []>} : vector<16x128xbf16>, vector<128x128xbf16>, vector<16x128xf32> -> vector<16x128xf32>
    %50 = vector.broadcast %6 : vector<1x128xf32> to vector<16x128xf32>
    %51 = arith.addf %49, %50 : vector<16x128xf32>
    %cst_24 = arith.constant 0.000000e+00 : f32
    %52 = vector.broadcast %cst_24 : f32 to vector<16x128xf32>
    %53 = arith.maximumf %51, %52 : vector<16x128xf32>
    %54 = arith.truncf %53 : vector<16x128xf32> to vector<16x128xbf16>
    %c784 = arith.constant 784 : index
    %c0_25 = arith.constant 0 : index
    %55 = vector.load %arg3[%c784, %c0_25] : memref<912x128xbf16, #tpu.memory_space<vmem>>, vector<128x128xbf16>
    %cst_26 = arith.constant dense<0.000000e+00> : vector<16x128xf32>
    %56 = tpu.matmul %54, %55, %cst_26 {dimension_numbers = #tpu.dot_dimension_numbers<[1], [0], [0], [1], [0, 0, 1, 1], [], []>} : vector<16x128xbf16>, vector<128x128xbf16>, vector<16x128xf32> -> vector<16x128xf32>
    %57 = vector.broadcast %7 : vector<1x128xf32> to vector<16x128xf32>
    %58 = arith.addf %56, %57 : vector<16x128xf32>
    %59 = arith.negf %58 : vector<16x128xf32>
    %60 = math.exp %59 : vector<16x128xf32>
    %cst_27 = arith.constant 1.000000e+00 : f32
    %61 = vector.broadcast %cst_27 : f32 to vector<16x128xf32>
    %62 = arith.addf %61, %60 : vector<16x128xf32>
    %63 = arith.divf %61, %62 : vector<16x128xf32>
    %c0_28 = arith.constant 0 : index
    %c0_29 = arith.constant 0 : index
    %64 = vector.load %arg5[%c0_28, %c0_29] : memref<16x128xf32, #tpu.memory_space<vmem>>, vector<16x128xf32>
    tpu.vector_store %arg5[%c0_28, %c0_29], %63 {strides = array<i32>} : memref<16x128xf32, #tpu.memory_space<vmem>>, vector<16x128xf32>,
    return
  }
}

</mosaic_0001>

<bundles_post_ra>
// kernel: tpu_custom_call.1
= control target key start
LH: loop header
LB: loop body
LE: loop exit
PB: predicated region body
PF: predicated region fallthrough
CT: control target
= control target key end

     0   :  { %10 = vsyncpa [#allocation3], 0  ;;  %s1264_s0 = inlined_call_operand.vmem [shape: bf16[16,16], index: 0, kind: input, shape index: {}]   ;;  %s1265_s1 = inlined_call_operand.vmem [shape: bf16[16,16], index: 1, kind: input, shape index: {}]   ;;  %s1266_s2 = inlined_call_operand.vmem [shape: f32[16,1], index: 2, kind: input, shape index: {}]   ;;  %s1267_s3 = inlined_call_operand.hbm [shape: bf16[912,128], index: 3, kind: input, shape index: {}]   ;;  %s1268_s4 = inlined_call_operand.hbm [shape: f32[8,128], index: 4, kind: input, shape index: {}]   ;;  %s1269_s5 = inlined_call_operand.hbm [shape: f32[16,128], index: 5, kind: output, shape index: {}]  }
   0x1   :  { %11 = vsyncpa [#allocation6], 0 }
   0x2   :  { %12 = vsyncpa [#allocation4], 0  ;;  %s23_s20 = sshll.u32 %s1267_s3, 4  ;;  %s1181_s21 = smov [#allocation2]   ;;  %s24_s20 = int_to_ptr.hbm [resolvable:$true] %s23_s20 }
   0x3   :  { %s25_s22 = sshll.u32 %s1181_s21, 4  ;;  %s37_s25 = sshll.u32 %s1268_s4, 4  ;;  %s26_s22 = int_to_ptr.vmem [resolvable:$true] %s25_s22  ;;  %s38_s25 = int_to_ptr.hbm [resolvable:$true] %s37_s25 }
   0x4   :  { %s1182_s26 = smov 64   ;;  %s1183_s27 = smov 4  }
   0x5   :  { %31 = dma.hbm_to_vmem [thread:$0]  %s24_s20, 7296, %s26_s22, [#allocation3], %s1182_s26, %s1182_s26, %s1183_s27  }
   0x6   :  { %s1184_s28 = smov [#allocation5]  }
   0x7   :  { %s39_s29 = sshll.u32 %s1184_s28, 4  ;;  %s40_s29 = int_to_ptr.vmem [resolvable:$true] %s39_s29 }
   0x8   :  { %42 = dma.hbm_to_vmem [thread:$0]  %s38_s25, 128, %s40_s29, [#allocation6]  }
   0x9   :  { %1175 = dma.done.wait [#allocation3], 7296  }
   0xa   :  { %1176 = vsyncadd [#allocation3], 4294960000 }
   0xb   :  { %1177 = dma.done.wait [#allocation6], 128  }
   0xc   :  { %1178 = vsyncadd [#allocation6], 4294967168  ;;  %v1029_v0 = vld [vmem:[#allocation2] sm:$0xff]  ;;  %vm72_vm0 = vcmask 130048   ;;  %v1036_v3 = vld [vmem:[#allocation2 + $0x38] sm:$0xff]  ;;  %v1185_v33 = vmov 0  }
   0xd   :  { %v1037_v1 = vld [vmem:[#allocation2 + $0x40] sm:$0xff]  ;;  %83 = vmatpush.bf16.msra.mxu0 %v1029_v0  ;;  %v1035_v4 = vld [vmem:[#allocation2 + $0x30] sm:$0xff]  ;;  %v1034_v5 = vld [vmem:[#allocation2 + $0x28] sm:$0xff]  ;;  %1094 = vset.pattern.permute.xlu0 %v1185_v33  ;;  %s771_s12 = sshll.u32 %s1269_s5, 4  ;;  %s1187_s13 = smov 128   ;;  %s772_s12 = int_to_ptr.hbm [resolvable:$true] %s771_s12 }
   0xe   :  { %v1028_v2 = vld [vmem:[%s1264_s0] sm:$0xff]  ;;  %158 = vmatpush.bf16.msra.mxu1 %v1037_v1  ;;  %v1032_v7 = vld [vmem:[#allocation2 + $0x18] sm:$0xff]  ;;  %v1031_v8 = vld [vmem:[#allocation2 + $0x10] sm:$0xff]  ;;  %s1188_s14 = smov 8  }
   0xf   :  { %v1033_v6 = vld [vmem:[#allocation2 + $0x20] sm:$0xff]  ;;  %v1030_v9 = vld [vmem:[#allocation2 + $0x8] sm:$0xff]  ;;  %v1052_v24 = vld [vmem:[#allocation2 + $0xb8] sm:$0xff] }
  0x10   :  { %793 = vmatmul.msk.bf16.vlgmr.msra.gmra.mxu0 %vm72_vm0, %v1028_v2  ;;  %v1229_v16 = vld [vmem:[#allocation5] sm:$0xff]  ;;  %v1053_v21 = vld [vmem:[#allocation2 + $0xc0] sm:$0xff]  ;;  %v1051_v25 = vld [vmem:[#allocation2 + $0xb0] sm:$0xff] }
  0x11   :  { %v109_v17 = vperm.slane %v1229_v16, 0  ;;  %v1235_v23 = vld [vmem:[%s1265_s1] sm:$0xff]  ;;  %v1050_v26 = vld [vmem:[#allocation2 + $0xa8] sm:$0xff]  ;;  %v1048_v28 = vld [vmem:[#allocation2 + $0x98] sm:$0xff]  ;;  %v257_v0 = vperm.slane %v1229_v16, 1 }
  0x12   :  { %159 = vmatpush.bf16.msra.mxu1 %v1036_v3  ;;  %v1049_v27 = vld [vmem:[#allocation2 + $0xa0] sm:$0xff]  ;;  %v1047_v29 = vld [vmem:[#allocation2 + $0x90] sm:$0xff]  ;;  %v1046_v30 = vld [vmem:[#allocation2 + $0x88] sm:$0xff] }
  0x13   :  { %v54_v31 = vld [vmem:[%s1266_s2] sm:$0xff]  ;;  %v1044_v34 = vld [vmem:[#allocation2 + $0x78] sm:$0xff]  ;;  %v1043_v35 = vld [vmem:[#allocation2 + $0x70] sm:$0xff] }
  0x14   :  { %v1045_v32 = vld [vmem:[#allocation2 + $0x80] sm:$0xff]  ;;  %214 = vperm.xlu0 %1094, %v54_v31   ;;  %v55_v36 = vld [vmem:[%s1266_s2 + $0x8] sm:$0xff]  ;;  %v1040_v44 = vld [vmem:[#allocation2 + $0x58] sm:$0xff]  ;;  %s1186_s2 = smov [#allocation7]  }
  0x15   :  { %354 = vmatpush.bf16.msrb.mxu0 %v1045_v32  ;;  %v1042_v42 = vld [vmem:[#allocation2 + $0x68] sm:$0xff]  ;;  %v1041_v43 = vld [vmem:[#allocation2 + $0x60] sm:$0xff]  ;;  %v1039_v45 = vld [vmem:[#allocation2 + $0x50] sm:$0xff]  ;;  %s769_s9 = sshll.u32 %s1186_s2, 4  ;;  %s770_s9 = int_to_ptr.vmem [resolvable:$true] %s769_s9 }
  0x16   :  { %160 = vmatpush.bf16.msra.mxu1 %v1035_v4  ;;  %v1038_v46 = vld [vmem:[#allocation2 + $0x48] sm:$0xff]  ;;  %v1069_v47 = vld [vmem:[#allocation2 + $0x140] sm:$0xff]  ;;  %v1068_v48 = vld [vmem:[#allocation2 + $0x138] sm:$0xff] }
  0x17   :  { %v1067_v49 = vld [vmem:[#allocation2 + $0x130] sm:$0xff]  ;;  %v1066_v50 = vld [vmem:[#allocation2 + $0x128] sm:$0xff]  ;;  %v1065_v58 = vld [vmem:[#allocation2 + $0x120] sm:$0xff] }
  0x18   :  { %v1064_v59 = vld [vmem:[#allocation2 + $0x118] sm:$0xff]  ;;  %v1063_v60 = vld [vmem:[#allocation2 + $0x110] sm:$0xff]  ;;  %v1062_v61 = vld [vmem:[#allocation2 + $0x108] sm:$0xff] }
  0x19   :  { %355 = vmatpush.bf16.msrb.mxu0 %v1044_v34  ;;  %v1070_v31 = vld [vmem:[#allocation2 + $0x148] sm:$0xff]  ;;  %v1085_v32 = vld [vmem:[#allocation2 + $0x1c0] sm:$0xff]  ;;  %v1084_v33 = vld [vmem:[#allocation2 + $0x1b8] sm:$0xff] }
  0x1a   :  { %161 = vmatpush.bf16.msra.mxu1 %v1034_v5  ;;  %v1083_v34 = vld [vmem:[#allocation2 + $0x1b0] sm:$0xff] }
  0x1c   :  { %219 = vperm.xlu0 %1094, %v55_v36   ;;  %v434_v36 = vperm.slane %v1229_v16, 2 }
  0x1d   :  { %356 = vmatpush.bf16.msrb.mxu0 %v1043_v35  ;;  %v1082_v35 = vld [vmem:[#allocation2 + $0x1a8] sm:$0xff] }
  0x1e   :  { %162 = vmatpush.bf16.msra.mxu1 %v1033_v6 }
  0x21   :  { %357 = vmatpush.bf16.msrb.mxu0 %v1042_v42 }
  0x22   :  { %163 = vmatpush.bf16.msra.mxu1 %v1032_v7 }
  0x25   :  { %358 = vmatpush.bf16.msrb.mxu0 %v1041_v43 }
  0x26   :  { %164 = vmatpush.bf16.msra.mxu1 %v1031_v8 }
  0x29   :  { %359 = vmatpush.bf16.msrb.mxu0 %v1040_v44 }
  0x2a   :  { %165 = vmatpush.bf16.msra.mxu1 %v1030_v9  ;;  %v1061_v9 = vld [vmem:[#allocation2 + $0x100] sm:$0xff] }
  0x2d   :  { %360 = vmatpush.bf16.msrb.mxu0 %v1039_v45 }
  0x2e   :  { %545 = vmatpush.bf16.msrb.mxu1 %v1069_v47 }
  0x31   :  { %361 = vmatpush.bf16.msrb.mxu0 %v1038_v46 }
  0x32   :  { %546 = vmatpush.bf16.msrb.mxu1 %v1068_v48 }
  0x36   :  { %547 = vmatpush.bf16.msrb.mxu1 %v1067_v49 }
  0x3a   :  { %548 = vmatpush.bf16.msrb.mxu1 %v1066_v50 }
  0x3e   :  { %549 = vmatpush.bf16.msrb.mxu1 %v1065_v58 }
  0x42   :  { %550 = vmatpush.bf16.msrb.mxu1 %v1064_v59 }
  0x46   :  { %551 = vmatpush.bf16.msrb.mxu1 %v1063_v60 }
  0x4a   :  { %552 = vmatpush.bf16.msrb.mxu1 %v1062_v61 }
  0x86   :  { %v215_v51 = vpop.permute.xlu0 %214 }
  0x8d   :  { %v85_v10 = vpop.f32.mrf.mxu0 }
  0x8e   :  { %v90_v12 = vmax.f32 %v85_v10, 0.0  ;;  %v220_v53 = vpop.permute.xlu0 %219 }
  0x95   :  { %v87_v11 = vpop.f32.mrf.mxu0 }
  0x96   :  { %v91_v13 = vmax.f32 %v87_v11, 0.0  ;;  %v1060_v11 = vld [vmem:[#allocation2 + $0xf8] sm:$0xff] }
  0x98   :  { %v92_v14 = vpack.c.bf16 %v91_v13, %v90_v12  ;;  %v1059_v12 = vld [vmem:[#allocation2 + $0xf0] sm:$0xff]  ;;  %v1058_v13 = vld [vmem:[#allocation2 + $0xe8] sm:$0xff] }
  0x9a   :  { %166 = vmatmul.bf16.vlgmr.msra.gmra.mxu1 %v92_v14  ;;  %v1057_v14 = vld [vmem:[#allocation2 + $0xe0] sm:$0xff] }
 0x117   :  { %v167_v15 = vpop.f32.mrf.mxu1 }
 0x118   :  { %v168_v19 = vadd.f32 %v167_v15, %v109_v17  ;;  %v1056_v15 = vld [vmem:[#allocation2 + $0xd8] sm:$0xff] }
 0x11f   :  { %v169_v18 = vpop.f32.mrf.mxu1 }
 0x120   :  { %v170_v20 = vadd.f32 %v169_v18, %v109_v17  ;;  %v1055_v17 = vld [vmem:[#allocation2 + $0xd0] sm:$0xff]  ;;  %v1054_v18 = vld [vmem:[#allocation2 + $0xc8] sm:$0xff] }
 0x122   :  { %v172_v22 = vpack.c.bf16 %v170_v20, %v168_v19  ;;  %v1077_v19 = vld [vmem:[#allocation2 + $0x180] sm:$0xff]  ;;  %v1076_v20 = vld [vmem:[#allocation2 + $0x178] sm:$0xff] }
 0x123   :  { %629 = vmatpush.bf16.msra.mxu0 %v1077_v19 }
 0x124   :  { %188 = vmatpush.bf16.msra.mxu2 %v172_v22 }
 0x127   :  { %830 = vmatmul.msk.bf16.vlgmr.msra.gmra.mxu2 %vm72_vm0, %v1235_v23  ;;  %630 = vmatpush.bf16.msra.mxu0 %v1076_v20 }
 0x128   :  { %368 = vmatpush.bf16.msrb.mxu2 %v1053_v21  ;;  %v1075_v21 = vld [vmem:[#allocation2 + $0x170] sm:$0xff] }
 0x12b   :  { %631 = vmatpush.bf16.msra.mxu0 %v1075_v21 }
 0x12c   :  { %369 = vmatpush.bf16.msrb.mxu2 %v1052_v24 }
 0x130   :  { %370 = vmatpush.bf16.msrb.mxu2 %v1051_v25 }
 0x134   :  { %371 = vmatpush.bf16.msrb.mxu2 %v1050_v26 }
 0x138   :  { %372 = vmatpush.bf16.msrb.mxu2 %v1049_v27  ;;  %v1074_v27 = vld [vmem:[#allocation2 + $0x168] sm:$0xff] }
 0x139   :  { %632 = vmatpush.bf16.msra.mxu0 %v1074_v27 }
 0x13c   :  { %373 = vmatpush.bf16.msrb.mxu2 %v1048_v28  ;;  %v1073_v28 = vld [vmem:[#allocation2 + $0x160] sm:$0xff] }
 0x13d   :  { %633 = vmatpush.bf16.msra.mxu0 %v1073_v28 }
 0x140   :  { %374 = vmatpush.bf16.msrb.mxu2 %v1047_v29  ;;  %v1072_v29 = vld [vmem:[#allocation2 + $0x158] sm:$0xff] }
 0x141   :  { %634 = vmatpush.bf16.msra.mxu0 %v1072_v29 }
 0x144   :  { %375 = vmatpush.bf16.msrb.mxu2 %v1046_v30  ;;  %v1071_v30 = vld [vmem:[#allocation2 + $0x150] sm:$0xff] }
 0x145   :  { %635 = vmatpush.bf16.msra.mxu0 %v1071_v30 }
 0x148   :  { %711 = vmatpush.bf16.msra.mxu2 %v1085_v32 }
 0x149   :  { %636 = vmatpush.bf16.msra.mxu0 %v1070_v31 }
 0x14c   :  { %712 = vmatpush.bf16.msra.mxu2 %v1084_v33 }
 0x150   :  { %713 = vmatpush.bf16.msra.mxu2 %v1083_v34 }
 0x154   :  { %714 = vmatpush.bf16.msra.mxu2 %v1082_v35 }
 0x1aa   :  { %v1245_v37 = vpop.f32.mrf.mxu2 }
 0x1ab   :  { %v195_v39 = vmax.f32 %v1245_v37, 0.0 }
 0x1b2   :  { %v1247_v38 = vpop.f32.mrf.mxu2 }
 0x1b3   :  { %v196_v40 = vmax.f32 %v1247_v38, 0.0 }
 0x1b5   :  { %v197_v41 = vpack.c.bf16 %v196_v40, %v195_v39 }
 0x1b7   :  { %205 = vmatpush.bf16.msra.mxu3 %v197_v41  ;;  %376 = vmatmul.bf16.vlgmr.msrb.gmra.mxu2 %v197_v41 }
 0x1ba   :  { %831 = vmatmul.msk.bf16.vlgmr.msra.gmra.mxu3 %vm72_vm0, %v1235_v23 }
 0x23a   :  { %v377_v62 = vpop.f32.mrf.mxu2 }
 0x23d   :  { %v207_v52 = vpop.f32.mrf.mxu3 }
 0x23e   :  { %v222_v55 = vmul.f32 %v215_v51, %v207_v52  ;;  %v1081_v52 = vld [vmem:[#allocation2 + $0x1a0] sm:$0xff] }
 0x23f   :  { %715 = vmatpush.bf16.msra.mxu2 %v1081_v52 }
 0x242   :  { %v379_v5 = vpop.f32.mrf.mxu2 }
 0x245   :  { %v209_v54 = vpop.f32.mrf.mxu3 }
 0x246   :  { %v223_v56 = vmul.f32 %v220_v53, %v209_v54  ;;  %v1079_v54 = vld [vmem:[#allocation2 + $0x190] sm:$0xff] }
 0x248   :  { %v224_v57 = vpack.c.bf16 %v223_v56, %v222_v55  ;;  %v1078_v55 = vld [vmem:[#allocation2 + $0x188] sm:$0xff] }
 0x24a   :  { %362 = vmatmul.bf16.vlgmr.msrb.gmra.mxu0 %v224_v57  ;;  %v580_v57 = vperm.slane %v1229_v16, 3 }
 0x2c7   :  { %v363_v63 = vpop.f32.mrf.mxu0 }
 0x2c8   :  { %v364_v1 = vadd.f32 %v363_v63, %v257_v0 }
 0x2ca   :  { %v378_v3 = vadd.f32 %v377_v62, %v364_v1 }
 0x2cc   :  { %v382_v7 = vmax.f32 %v378_v3, 0.0 }
 0x2cf   :  { %v365_v2 = vpop.f32.mrf.mxu0 }
 0x2d0   :  { %v366_v4 = vadd.f32 %v365_v2, %v257_v0 }
 0x2d2   :  { %v380_v6 = vadd.f32 %v379_v5, %v366_v4 }
 0x2d4   :  { %v383_v8 = vmax.f32 %v380_v6, 0.0 }
 0x2d6   :  { %v384_v10 = vpack.c.bf16 %v383_v8, %v382_v7 }
 0x2d8   :  { %392 = vmatpush.bf16.msrb.mxu3 %v384_v10  ;;  %553 = vmatmul.bf16.vlgmr.msrb.gmra.mxu1 %v384_v10 }
 0x2db   :  { %896 = vmatmul.msk.bf16.vlgmr.msrb.gmra.mxu3 %vm72_vm0, %v1235_v23 }
 0x2dc   :  { %531 = vmatpush.bf16.msra.mxu3 %v1061_v9 }
 0x2e0   :  { %532 = vmatpush.bf16.msra.mxu3 %v1060_v11 }
 0x2e4   :  { %533 = vmatpush.bf16.msra.mxu3 %v1059_v12 }
 0x2e8   :  { %534 = vmatpush.bf16.msra.mxu3 %v1058_v13 }
 0x2ec   :  { %535 = vmatpush.bf16.msra.mxu3 %v1057_v14 }
 0x2f0   :  { %536 = vmatpush.bf16.msra.mxu3 %v1056_v15 }
 0x2f4   :  { %537 = vmatpush.bf16.msra.mxu3 %v1055_v17 }
 0x2f8   :  { %538 = vmatpush.bf16.msra.mxu3 %v1054_v18 }
 0x355   :  { %v554_v39 = vpop.f32.mrf.mxu1 }
 0x35d   :  { %v556_v45 = vpop.f32.mrf.mxu1 }
 0x35e   :  { %v394_v22 = vpop.f32.mrf.mxu3 }
 0x35f   :  { %v399_v24 = vmul.f32 %v394_v22, %v215_v51 }
 0x366   :  { %v396_v23 = vpop.f32.mrf.mxu3 }
 0x367   :  { %v400_v25 = vmul.f32 %v396_v23, %v220_v53  ;;  %v1080_v53 = vld [vmem:[#allocation2 + $0x198] sm:$0xff] }
 0x368   :  { %716 = vmatpush.bf16.msra.mxu2 %v1080_v53 }
 0x369   :  { %v401_v26 = vpack.c.bf16 %v400_v25, %v399_v24 }
 0x36b   :  { %539 = vmatmul.bf16.vlgmr.msra.gmra.mxu3 %v401_v26 }
 0x36c   :  { %717 = vmatpush.bf16.msra.mxu2 %v1079_v54 }
 0x370   :  { %718 = vmatpush.bf16.msra.mxu2 %v1078_v55 }
 0x3ee   :  { %v540_v40 = vpop.f32.mrf.mxu3 }
 0x3ef   :  { %v541_v41 = vadd.f32 %v540_v40, %v434_v36 }
 0x3f1   :  { %v555_v42 = vadd.f32 %v554_v39, %v541_v41 }
 0x3f3   :  { %v559_v46 = vmax.f32 %v555_v42, 0.0 }
 0x3f5   :  { %v561_v49 = vadd.f32 %v559_v46, %v1245_v37 }
 0x3f6   :  { %v542_v43 = vpop.f32.mrf.mxu3 }
 0x3f7   :  { %v543_v44 = vadd.f32 %v542_v43, %v434_v36 }
 0x3f9   :  { %v557_v47 = vadd.f32 %v556_v45, %v543_v44 }
 0x3fb   :  { %v560_v48 = vmax.f32 %v557_v47, 0.0 }
 0x3fd   :  { %v562_v50 = vadd.f32 %v560_v48, %v1247_v38  ;;  %v662_v38 = vperm.slane %v1229_v16, 4 }
 0x3ff   :  { %v563_v51 = vpack.c.bf16 %v562_v50, %v561_v49 }
 0x401   :  { %637 = vmatmul.bf16.vlgmr.msra.gmra.mxu0 %v563_v51 }
 0x47e   :  { %v638_v56 = vpop.f32.mrf.mxu0 }
 0x47f   :  { %v639_v58 = vadd.f32 %v638_v56, %v580_v57 }
 0x481   :  { %v643_v61 = vmax.f32 %v639_v58, 0.0 }
 0x486   :  { %v640_v59 = vpop.f32.mrf.mxu0 }
 0x487   :  { %v641_v60 = vadd.f32 %v640_v59, %v580_v57 }
 0x489   :  { %v644_v37 = vmax.f32 %v641_v60, 0.0 }
 0x48b   :  { %v645_v62 = vpack.c.bf16 %v644_v37, %v643_v61 }
 0x48d   :  { %719 = vmatmul.bf16.vlgmr.msra.gmra.mxu2 %v645_v62 }
 0x510   :  { %v720_v63 = vpop.f32.mrf.mxu2 }
 0x511   :  { %v721_v0 = vadd.f32 %v720_v63, %v662_v38 }
 0x513   :  { %v1025_v1 = vmul.f32 -1.442695, %v721_v0 }
 0x515   :  { %1095 = vpow2.f32 %v1025_v1 }
 0x518   :  { %v722_v2 = vpop.f32.mrf.mxu2 }
 0x519   :  { %v723_v3 = vadd.f32 %v722_v2, %v662_v38 }
 0x51b   :  { %v1096_v4 = vpop.eup %1095  ;;  %v1026_v5 = vmul.f32 -1.442695, %v723_v3 }
 0x51c   :  { %v731_v6 = vadd.f32 1.0, %v1096_v4 }
 0x51d   :  { %1097 = vpow2.f32 %v1026_v5 }
 0x51e   :  { %1099 = vrcp.f32 %v731_v6  ;;  %v744_v12 = vand.u32 2147483648, %v731_v6  ;;  %v742_v16 = vand.u32 2147483647, %v731_v6  ;;  %vm738_vm2 = vweird.f32 %v731_v6 }
 0x520   :  { %v745_v17 = vor.u32 1.1754944e-38, %v744_v12  ;;  %vm743_vm4 = vcmp.eq.f32.partialorder %v742_v16, 8.507059e+37 }
 0x523   :  { %v1098_v7 = vpop.eup %1097 }
 0x524   :  { %v1100_v8 = vpop.eup %1099  ;;  %v732_v9 = vadd.f32 1.0, %v1098_v7 }
 0x525   :  { %v734_v10 = vmul.f32 %v1100_v8, %v731_v6  ;;  %vm739_vm1 = vweird.f32 %v1100_v8 }
 0x526   :  { %1101 = vrcp.f32 %v732_v9  ;;  %vm740_vm3 = vmor %vm738_vm2, %vm739_vm1  ;;  %v759_v22 = vand.u32 2147483648, %v732_v9  ;;  %v757_v24 = vand.u32 2147483647, %v732_v9  ;;  %vm753_vm6 = vweird.f32 %v732_v9 }
 0x527   :  { %v735_v11 = vsub.f32 1.0, %v734_v10 }
 0x528   :  { %v760_v26 = vor.u32 1.1754944e-38, %v759_v22  ;;  %vm758_vm8 = vcmp.eq.f32.partialorder %v757_v24, 8.507059e+37 }
 0x529   :  { %v736_v13 = vmul.f32 %v1100_v8, %v735_v11 }
 0x52b   :  { %v737_v14 = vadd.f32 %v1100_v8, %v736_v13 }
 0x52c   :  { %v1102_v15 = vpop.eup %1101 }
 0x52d   :  { %v749_v18 = vmul.f32 %v1102_v15, %v732_v9  ;;  %v741_v19 = vsel %vm740_vm3, %v1100_v8, %v737_v14  ;;  %vm754_vm5 = vweird.f32 %v1102_v15 }
 0x52e   :  { %v746_v20 = vsel %vm743_vm4, %v745_v17, %v741_v19  ;;  %vm755_vm7 = vmor %vm753_vm6, %vm754_vm5 }
 0x52f   :  { %v750_v21 = vsub.f32 1.0, %v749_v18  ;;  %763 = vst [vmem:[#allocation7] sm:$0xff] %v746_v20 }
 0x531   :  { %v751_v23 = vmul.f32 %v1102_v15, %v750_v21 }
 0x533   :  { %v752_v25 = vadd.f32 %v1102_v15, %v751_v23 }
 0x535   :  { %v756_v27 = vsel %vm755_vm7, %v1102_v15, %v752_v25 }
 0x536   :  { %v761_v28 = vsel %vm758_vm8, %v760_v26, %v756_v27 }
 0x537   :  { %764 = vst [vmem:[#allocation7 + $0x8] sm:$0xff] %v761_v28 }
 0x538   :  { %777 = dma.vmem_to_hbm [thread:$0]  %s770_s9, 256, %s772_s12, [#allocation4], %s1187_s13, %s1187_s13, %s1188_s14  }
 0x539   :  { %1179 = dma.done.wait [#allocation4], 256  }
 0x53a   :  { %1180 = vsyncadd [#allocation4], 4294967040 }
 0x53b   :  { %782 = vsyncpa [#allocation3], 1 }
 0x53c   :  { %783 = vsyncpa [#allocation6], 1 }
 0x53d   :  { %784 = vsyncpa [#allocation4], 1 }

</bundles_post_ra>
